<compile_context>
chip_gen: v7x
topology: tpu7x:2x2x1
jax: 0.10.0
libtpu: 0.0.40
codegen_flags: <defaults>
</compile_context>

<pallas_src>
import jax
import jax.numpy as jnp
from jax.experimental import pallas as pl
from jax.experimental.pallas import tpu as pltpu


def _self_attention_kernel(xT_ref, w12_ref, b_ref, v_ref, out_ref, s_ref):
    """One grid step processes `bt` batch elements.

    xT_ref : (bt, H, L)  inputs, feature-major per batch element
    w12_ref: (2H, H)     stacked [W1; W2]
    b_ref  : (H, 1)      attn bias as a column
    v_ref  : (1, H)      score weight as a row
    out_ref: (bt, L, L)  softmax(energy, axis=i)
    s_ref  : (L, L)      f32 scratch for one batch element's energies
    """
    bt, h, l = xT_ref.shape

    w12 = w12_ref[...]      # (2H, H)
    b_col = b_ref[...]      # (H, 1)
    v_row = v_ref[...]      # (1, H)

    # All loops are static (trace-time).  For very long sequences convert the
    # inner row loop to lax.fori_loop over ref slices to bound code size.
    for b in range(bt):
        # Fused projection of both concat halves, feature-major:
        #   abT[:H, i] = W1 @ x[b, i]       abT[H:, j] = W2 @ x[b, j]
        abT = jnp.dot(w12, xT_ref[b], preferred_element_type=jnp.float32)   # (2H, L)
        aT = abT[:h, :] + b_col                                             # (H, L)
        bmT = abT[h:, :]                                                    # (H, L)

        # Stream the (L, L) energy matrix one i-row at a time; live tanh
        # intermediate is only (H, L) and the H-contraction runs on the MXU.
        for i in range(l):
            feat = jnp.tanh(aT[:, i:i + 1] + bmT)                           # (H, L)
            s_ref[i:i + 1, :] = jnp.dot(
                v_row, feat, preferred_element_type=jnp.float32)            # (1, L)

        # Softmax over the i axis (axis 0 here == PyTorch dim=1).
        s = s_ref[...]                                                      # (L, L)
        m = jnp.max(s, axis=0, keepdims=True)
        ex = jnp.exp(s - m)
        denom = jnp.sum(ex, axis=0, keepdims=True)
        # approx=True would route this to the EUP fast-reciprocal; kept exact
        # here to preserve the 1e-5 comparison against the reference.
        inv = pl.reciprocal(denom, approx=False)
        out_ref[b] = (ex * inv).astype(out_ref.dtype)


def _pick_batch_block(batch):
    """Batches per grid step: amortize per-step overhead, but keep >= 2 grid
    steps so a 2-TensorCore chip (v7x) can split the parallel batch axis."""
    cap = max(1, min(8, batch // 2)) if batch > 1 else 1
    bt = cap
    while batch % bt:
        bt -= 1
    return bt


def self_attention_pallas(inputs, w_attn, b_attn, w_score, b_score=None):
    """inputs: (L, B, H) float32. Returns (B, L, L) attention weights."""
    L, B, H = inputs.shape

    # Feature-major per-batch layout (B, H, L): H sits on sublanes inside the
    # kernel so the v-contraction is an MXU matmul with L on lanes.
    xT = jnp.transpose(inputs.astype(jnp.float32), (1, 2, 0))               # (B, H, L)

    # Stack the two halves of the Linear(2H -> H) weight: [W1; W2]  (2H, H).
    w12 = jnp.concatenate([w_attn[:, :H], w_attn[:, H:]], axis=0).astype(jnp.float32)
    b_col = b_attn.reshape(H, 1).astype(jnp.float32)
    v_row = w_score.reshape(1, H).astype(jnp.float32)
    # b_score cancels under the softmax over dim=1 -> intentionally unused.
    del b_score

    bt = _pick_batch_block(B)
    grid = (B // bt,)

    # TODO(synk): for production shapes where L is not a multiple of 128, pad L
    # (masking padded i-rows with -inf before the softmax) so the output store
    # is lane-dense; at this demo shape it is a perf-only detail.
    return pl.pallas_call(
        _self_attention_kernel,
        out_shape=jax.ShapeDtypeStruct((B, L, L), jnp.float32),
        grid=grid,
        in_specs=[
            pl.BlockSpec((bt, H, L), lambda i: (i, 0, 0)),
            pl.BlockSpec((2 * H, H), lambda i: (0, 0)),
            pl.BlockSpec((H, 1), lambda i: (0, 0)),
            pl.BlockSpec((1, H), lambda i: (0, 0)),
        ],
        out_specs=pl.BlockSpec((bt, L, L), lambda i: (i, 0, 0)),
        scratch_shapes=[pltpu.VMEM((L, L), jnp.float32)],
        compiler_params=pltpu.CompilerParams(
            dimension_semantics=("parallel",)),
    )(xT, w12, b_col, v_row)


def self_attention_reference(inputs, w_attn, b_attn, w_score, b_score):
    """Pure-JAX transcription of the PyTorch forward for verification."""
    L, B, H = inputs.shape
    x = jnp.transpose(inputs, (1, 0, 2))                        # (B, L, H)
    sen1 = jnp.broadcast_to(x[:, :, None, :], (B, L, L, H))
    sen2 = jnp.broadcast_to(x[:, None, :, :], (B, L, L, H))
    energy_in = jnp.concatenate([sen1, sen2], axis=3)           # (B, L, L, 2H)
    feat = jnp.tanh(energy_in @ w_attn.T + b_attn)              # (B, L, L, H)
    energies = (feat @ w_score.T + b_score)[..., 0]             # (B, L, L)
    return jax.nn.softmax(energies, axis=1)


if __name__ == "__main__":
    L, B, H = 8, 2, 32  # max_len, batch, hidden_size

    key = jax.random.PRNGKey(0)
    k_in, k_w1, k_b1, k_w2, k_b2 = jax.random.split(key, 5)

    inputs = jax.random.normal(k_in, (L, B, H), dtype=jnp.float32)

    # Deterministic PyTorch-style uniform init (bound = 1/sqrt(fan_in)).
    bound1 = 1.0 / jnp.sqrt(jnp.float32(2 * H))
    w_attn = jax.random.uniform(k_w1, (H, 2 * H), jnp.float32, -bound1, bound1)
    b_attn = jax.random.uniform(k_b1, (H,), jnp.float32, -bound1, bound1)
    bound2 = 1.0 / jnp.sqrt(jnp.float32(H))
    w_score = jax.random.uniform(k_w2, (1, H), jnp.float32, -bound2, bound2)
    b_score = jax.random.uniform(k_b2, (1,), jnp.float32, -bound2, bound2)

    out = self_attention_pallas(inputs, w_attn, b_attn, w_score, b_score)
    out = jax.block_until_ready(out)

    ref = self_attention_reference(inputs, w_attn, b_attn, w_score, b_score)
    assert out.shape == (B, L, L)
    assert jnp.allclose(out, ref, atol=1e-5, rtol=1e-5), "mismatch vs reference"

    print("KERNEL_OK")
</pallas_src>

<mosaic_0001>
module attributes {stable_mosaic.version = 11 : i64} {
  func.func @_self_attention_kernel(%arg0: i32, %arg1: memref<1x32x8xf32, #tpu.memory_space<vmem>>, %arg2: memref<64x32xf32, #tpu.memory_space<vmem>>, %arg3: memref<32x1xf32, #tpu.memory_space<vmem>>, %arg4: memref<1x32xf32, #tpu.memory_space<vmem>>, %arg5: memref<1x8x8xf32, #tpu.memory_space<vmem>>, %arg6: memref<8x8xf32, #tpu.memory_space<vmem>>) attributes {dimension_semantics = [#tpu.dimension_semantics<parallel>], iteration_bounds = array<i64: 2>, scalar_prefetch = 0 : i64, scratch_operands = 1 : i64, tpu.core_type = #tpu.core_type<tc>, window_params = [{transform_indices = @transform_0, window_bounds = array<i64: 1, 32, 8>}, {pipeline_mode = #tpu.pipeline_mode<synchronous>, transform_indices = @transform_1, window_bounds = array<i64: 64, 32>}, {pipeline_mode = #tpu.pipeline_mode<synchronous>, transform_indices = @transform_2, window_bounds = array<i64: 32, 1>}, {pipeline_mode = #tpu.pipeline_mode<synchronous>, transform_indices = @transform_3, window_bounds = array<i64: 1, 32>}, {transform_indices = @transform_4, window_bounds = array<i64: 1, 8, 8>}]} {
    %c0 = arith.constant 0 : index
    %c0_0 = arith.constant 0 : index
    %0 = vector.load %arg2[%c0, %c0_0] : memref<64x32xf32, #tpu.memory_space<vmem>>, vector<64x32xf32>
    %c0_1 = arith.constant 0 : index
    %c0_2 = arith.constant 0 : index
    %1 = vector.load %arg3[%c0_1, %c0_2] : memref<32x1xf32, #tpu.memory_space<vmem>>, vector<32x1xf32>
    %c0_3 = arith.constant 0 : index
    %c0_4 = arith.constant 0 : index
    %2 = vector.load %arg4[%c0_3, %c0_4] : memref<1x32xf32, #tpu.memory_space<vmem>>, vector<1x32xf32>
    %c0_5 = arith.constant 0 : index
    %c0_6 = arith.constant 0 : index
    %c0_7 = arith.constant 0 : index
    %3 = vector.load %arg1[%c0_5, %c0_6, %c0_7] : memref<1x32x8xf32, #tpu.memory_space<vmem>>, vector<1x32x8xf32>
    %4 = vector.shape_cast %3 : vector<1x32x8xf32> to vector<32x8xf32>
    %cst = arith.constant dense<0.000000e+00> : vector<64x8xf32>
    %5 = tpu.matmul %0, %4, %cst {dimension_numbers = #tpu.dot_dimension_numbers<[1], [0], [0], [1], [0, 0, 1, 1], [], []>} : vector<64x32xf32>, vector<32x8xf32>, vector<64x8xf32> -> vector<64x8xf32>
    %6 = vector.extract_strided_slice %5 {offsets = [0, 0], sizes = [32, 8], strides = [1, 1]} : vector<64x8xf32> to vector<32x8xf32>
    %7 = vector.broadcast %1 : vector<32x1xf32> to vector<32x8xf32>
    %8 = arith.addf %6, %7 : vector<32x8xf32>
    %9 = vector.extract_strided_slice %5 {offsets = [32, 0], sizes = [32, 8], strides = [1, 1]} : vector<64x8xf32> to vector<32x8xf32>
    %10 = vector.extract_strided_slice %8 {offsets = [0, 0], sizes = [32, 1], strides = [1, 1]} : vector<32x8xf32> to vector<32x1xf32>
    %11 = vector.broadcast %10 : vector<32x1xf32> to vector<32x8xf32>
    %12 = arith.addf %11, %9 : vector<32x8xf32>
    %13 = math.tanh %12 : vector<32x8xf32>
    %cst_8 = arith.constant dense<0.000000e+00> : vector<1x8xf32>
    %14 = tpu.matmul %2, %13, %cst_8 {dimension_numbers = #tpu.dot_dimension_numbers<[1], [0], [0], [1], [0, 0, 1, 1], [], []>} : vector<1x32xf32>, vector<32x8xf32>, vector<1x8xf32> -> vector<1x8xf32>
    %c0_9 = arith.constant 0 : index
    %c0_10 = arith.constant 0 : index
    %15 = vector.load %arg6[%c0_9, %c0_10] : memref<8x8xf32, #tpu.memory_space<vmem>>, vector<1x8xf32>
    tpu.vector_store %arg6[%c0_9, %c0_10], %14 {strides = array<i32>} : memref<8x8xf32, #tpu.memory_space<vmem>>, vector<1x8xf32>,
    %16 = vector.extract_strided_slice %8 {offsets = [0, 1], sizes = [32, 1], strides = [1, 1]} : vector<32x8xf32> to vector<32x1xf32>
    %17 = vector.broadcast %16 : vector<32x1xf32> to vector<32x8xf32>
    %18 = arith.addf %17, %9 : vector<32x8xf32>
    %19 = math.tanh %18 : vector<32x8xf32>
    %cst_11 = arith.constant dense<0.000000e+00> : vector<1x8xf32>
    %20 = tpu.matmul %2, %19, %cst_11 {dimension_numbers = #tpu.dot_dimension_numbers<[1], [0], [0], [1], [0, 0, 1, 1], [], []>} : vector<1x32xf32>, vector<32x8xf32>, vector<1x8xf32> -> vector<1x8xf32>
    %c1 = arith.constant 1 : index
    %c0_12 = arith.constant 0 : index
    %21 = vector.load %arg6[%c1, %c0_12] : memref<8x8xf32, #tpu.memory_space<vmem>>, vector<1x8xf32>
    tpu.vector_store %arg6[%c1, %c0_12], %20 {strides = array<i32>} : memref<8x8xf32, #tpu.memory_space<vmem>>, vector<1x8xf32>,
    %22 = vector.extract_strided_slice %8 {offsets = [0, 2], sizes = [32, 1], strides = [1, 1]} : vector<32x8xf32> to vector<32x1xf32>
    %23 = vector.broadcast %22 : vector<32x1xf32> to vector<32x8xf32>
    %24 = arith.addf %23, %9 : vector<32x8xf32>
    %25 = math.tanh %24 : vector<32x8xf32>
    %cst_13 = arith.constant dense<0.000000e+00> : vector<1x8xf32>
    %26 = tpu.matmul %2, %25, %cst_13 {dimension_numbers = #tpu.dot_dimension_numbers<[1], [0], [0], [1], [0, 0, 1, 1], [], []>} : vector<1x32xf32>, vector<32x8xf32>, vector<1x8xf32> -> vector<1x8xf32>
    %c2 = arith.constant 2 : index
    %c0_14 = arith.constant 0 : index
    %27 = vector.load %arg6[%c2, %c0_14] : memref<8x8xf32, #tpu.memory_space<vmem>>, vector<1x8xf32>
    tpu.vector_store %arg6[%c2, %c0_14], %26 {strides = array<i32>} : memref<8x8xf32, #tpu.memory_space<vmem>>, vector<1x8xf32>,
    %28 = vector.extract_strided_slice %8 {offsets = [0, 3], sizes = [32, 1], strides = [1, 1]} : vector<32x8xf32> to vector<32x1xf32>
    %29 = vector.broadcast %28 : vector<32x1xf32> to vector<32x8xf32>
    %30 = arith.addf %29, %9 : vector<32x8xf32>
    %31 = math.tanh %30 : vector<32x8xf32>
    %cst_15 = arith.constant dense<0.000000e+00> : vector<1x8xf32>
    %32 = tpu.matmul %2, %31, %cst_15 {dimension_numbers = #tpu.dot_dimension_numbers<[1], [0], [0], [1], [0, 0, 1, 1], [], []>} : vector<1x32xf32>, vector<32x8xf32>, vector<1x8xf32> -> vector<1x8xf32>
    %c3 = arith.constant 3 : index
    %c0_16 = arith.constant 0 : index
    %33 = vector.load %arg6[%c3, %c0_16] : memref<8x8xf32, #tpu.memory_space<vmem>>, vector<1x8xf32>
    tpu.vector_store %arg6[%c3, %c0_16], %32 {strides = array<i32>} : memref<8x8xf32, #tpu.memory_space<vmem>>, vector<1x8xf32>,
    %34 = vector.extract_strided_slice %8 {offsets = [0, 4], sizes = [32, 1], strides = [1, 1]} : vector<32x8xf32> to vector<32x1xf32>
    %35 = vector.broadcast %34 : vector<32x1xf32> to vector<32x8xf32>
    %36 = arith.addf %35, %9 : vector<32x8xf32>
    %37 = math.tanh %36 : vector<32x8xf32>
    %cst_17 = arith.constant dense<0.000000e+00> : vector<1x8xf32>
    %38 = tpu.matmul %2, %37, %cst_17 {dimension_numbers = #tpu.dot_dimension_numbers<[1], [0], [0], [1], [0, 0, 1, 1], [], []>} : vector<1x32xf32>, vector<32x8xf32>, vector<1x8xf32> -> vector<1x8xf32>
    %c4 = arith.constant 4 : index
    %c0_18 = arith.constant 0 : index
    %39 = vector.load %arg6[%c4, %c0_18] : memref<8x8xf32, #tpu.memory_space<vmem>>, vector<1x8xf32>
    tpu.vector_store %arg6[%c4, %c0_18], %38 {strides = array<i32>} : memref<8x8xf32, #tpu.memory_space<vmem>>, vector<1x8xf32>,
    %40 = vector.extract_strided_slice %8 {offsets = [0, 5], sizes = [32, 1], strides = [1, 1]} : vector<32x8xf32> to vector<32x1xf32>
    %41 = vector.broadcast %40 : vector<32x1xf32> to vector<32x8xf32>
    %42 = arith.addf %41, %9 : vector<32x8xf32>
    %43 = math.tanh %42 : vector<32x8xf32>
    %cst_19 = arith.constant dense<0.000000e+00> : vector<1x8xf32>
    %44 = tpu.matmul %2, %43, %cst_19 {dimension_numbers = #tpu.dot_dimension_numbers<[1], [0], [0], [1], [0, 0, 1, 1], [], []>} : vector<1x32xf32>, vector<32x8xf32>, vector<1x8xf32> -> vector<1x8xf32>
    %c5 = arith.constant 5 : index
    %c0_20 = arith.constant 0 : index
    %45 = vector.load %arg6[%c5, %c0_20] : memref<8x8xf32, #tpu.memory_space<vmem>>, vector<1x8xf32>
    tpu.vector_store %arg6[%c5, %c0_20], %44 {strides = array<i32>} : memref<8x8xf32, #tpu.memory_space<vmem>>, vector<1x8xf32>,
    %46 = vector.extract_strided_slice %8 {offsets = [0, 6], sizes = [32, 1], strides = [1, 1]} : vector<32x8xf32> to vector<32x1xf32>
    %47 = vector.broadcast %46 : vector<32x1xf32> to vector<32x8xf32>
    %48 = arith.addf %47, %9 : vector<32x8xf32>
    %49 = math.tanh %48 : vector<32x8xf32>
    %cst_21 = arith.constant dense<0.000000e+00> : vector<1x8xf32>
    %50 = tpu.matmul %2, %49, %cst_21 {dimension_numbers = #tpu.dot_dimension_numbers<[1], [0], [0], [1], [0, 0, 1, 1], [], []>} : vector<1x32xf32>, vector<32x8xf32>, vector<1x8xf32> -> vector<1x8xf32>
    %c6 = arith.constant 6 : index
    %c0_22 = arith.constant 0 : index
    %51 = vector.load %arg6[%c6, %c0_22] : memref<8x8xf32, #tpu.memory_space<vmem>>, vector<1x8xf32>
    tpu.vector_store %arg6[%c6, %c0_22], %50 {strides = array<i32>} : memref<8x8xf32, #tpu.memory_space<vmem>>, vector<1x8xf32>,
    %52 = vector.extract_strided_slice %8 {offsets = [0, 7], sizes = [32, 1], strides = [1, 1]} : vector<32x8xf32> to vector<32x1xf32>
    %53 = vector.broadcast %52 : vector<32x1xf32> to vector<32x8xf32>
    %54 = arith.addf %53, %9 : vector<32x8xf32>
    %55 = math.tanh %54 : vector<32x8xf32>
    %cst_23 = arith.constant dense<0.000000e+00> : vector<1x8xf32>
    %56 = tpu.matmul %2, %55, %cst_23 {dimension_numbers = #tpu.dot_dimension_numbers<[1], [0], [0], [1], [0, 0, 1, 1], [], []>} : vector<1x32xf32>, vector<32x8xf32>, vector<1x8xf32> -> vector<1x8xf32>
    %c7 = arith.constant 7 : index
    %c0_24 = arith.constant 0 : index
    %57 = vector.load %arg6[%c7, %c0_24] : memref<8x8xf32, #tpu.memory_space<vmem>>, vector<1x8xf32>
    tpu.vector_store %arg6[%c7, %c0_24], %56 {strides = array<i32>} : memref<8x8xf32, #tpu.memory_space<vmem>>, vector<1x8xf32>,
    %c0_25 = arith.constant 0 : index
    %c0_26 = arith.constant 0 : index
    %58 = vector.load %arg6[%c0_25, %c0_26] : memref<8x8xf32, #tpu.memory_space<vmem>>, vector<8x8xf32>
    %cst_27 = arith.constant dense<0xFF800000> : vector<8xf32>
    %59 = vector.multi_reduction <maximumf>, %58, %cst_27 [0] : vector<8x8xf32> to vector<8xf32>
    %60 = vector.shape_cast %59 : vector<8xf32> to vector<1x8xf32>
    %61 = vector.broadcast %60 : vector<1x8xf32> to vector<8x8xf32>
    %62 = arith.subf %58, %61 : vector<8x8xf32>
    %63 = math.exp %62 : vector<8x8xf32>
    %cst_28 = arith.constant dense<0.000000e+00> : vector<8xf32>
    %64 = vector.multi_reduction <add>, %63, %cst_28 [0] : vector<8x8xf32> to vector<8xf32>
    %65 = vector.shape_cast %64 : vector<8xf32> to vector<1x8xf32>
    %66 = tpu.reciprocal %65 : vector<1x8xf32> -> vector<1x8xf32>
    %67 = vector.broadcast %66 : vector<1x8xf32> to vector<8x8xf32>
    %68 = arith.mulf %63, %67 : vector<8x8xf32>
    %c0_29 = arith.constant 0 : index
    %c0_30 = arith.constant 0 : index
    %c0_31 = arith.constant 0 : index
    %69 = vector.load %arg5[%c0_29, %c0_30, %c0_31] : memref<1x8x8xf32, #tpu.memory_space<vmem>>, vector<1x8x8xf32>
    %70 = vector.shape_cast %69 : vector<1x8x8xf32> to vector<8x8xf32>
    %71 = vector.shape_cast %68 : vector<8x8xf32> to vector<1x8x8xf32>
    tpu.vector_store %arg5[%c0_29, %c0_30, %c0_31], %71 {strides = array<i32>} : memref<1x8x8xf32, #tpu.memory_space<vmem>>, vector<1x8x8xf32>,
    return
  }
  func.func @transform_0(%arg0: i32) -> (i32, i32, i32) {
    %c0_i32 = arith.constant 0 : i32
    %c0_i32_0 = arith.constant 0 : i32
    %c0_i32_1 = arith.constant 0 : i32
    return %arg0, %c0_i32, %c0_i32_0 : i32, i32, i32
  }
  func.func @transform_1(%arg0: i32) -> (i32, i32) {
    %c0_i32 = arith.constant 0 : i32
    %c0_i32_0 = arith.constant 0 : i32
    %c0_i32_1 = arith.constant 0 : i32
    return %c0_i32, %c0_i32_0 : i32, i32
  }
  func.func @transform_2(%arg0: i32) -> (i32, i32) {
    %c0_i32 = arith.constant 0 : i32
    %c0_i32_0 = arith.constant 0 : i32
    %c0_i32_1 = arith.constant 0 : i32
    return %c0_i32, %c0_i32_0 : i32, i32
  }
  func.func @transform_3(%arg0: i32) -> (i32, i32) {
    %c0_i32 = arith.constant 0 : i32
    %c0_i32_0 = arith.constant 0 : i32
    %c0_i32_1 = arith.constant 0 : i32
    return %c0_i32, %c0_i32_0 : i32, i32
  }
  func.func @transform_4(%arg0: i32) -> (i32, i32, i32) {
    %c0_i32 = arith.constant 0 : i32
    %c0_i32_0 = arith.constant 0 : i32
    %c0_i32_1 = arith.constant 0 : i32
    return %arg0, %c0_i32, %c0_i32_0 : i32, i32, i32
  }
}

</mosaic_0001>

<bundles_post_ra>
// kernel: tpu_custom_call.1
= control target key start
LH: loop header
LB: loop body
LE: loop exit
PB: predicated region body
PF: predicated region fallthrough
CT: control target
= control target key end

     0   :  { %9 = vsyncpa [#allocation4], 0  ;;  %s2033_s0 = inlined_call_operand.vmem [shape: f32[2,32,8], index: 0, kind: input, shape index: {}]   ;;  %s2034_s1 = inlined_call_operand.vmem [shape: f32[64,32], index: 1, kind: input, shape index: {}]   ;;  %s2035_s2 = inlined_call_operand.vmem [shape: f32[32,1], index: 2, kind: input, shape index: {}]   ;;  %s2036_s3 = inlined_call_operand.vmem [shape: f32[1,32], index: 3, kind: input, shape index: {}]   ;;  %s2037_s4 = inlined_call_operand.hbm [shape: f32[2,8,8], index: 4, kind: output, shape index: {}]  }
   0x1   :  { %11 = vsyncpa [#allocation4 + $0x1], 0  ;;  %s1723_s15 = smov 0   ;;  %s1725_s16 = smov 0  }
   0x2   :  { %s1727_s17 = smov 0   ;;  %s1729_s18 = smov 0  }
   0x3 LB: > { %s1744_s19 = sadd.s32 4294967295, %s1684_s18   ;;  %s1230_s20 = sadd.s32 4294967294, %s1684_s18   ;;  %s1684_s18 = sphi %s1729_s18, %s2043_s18   ;;  %s1680_s17 = sphi %s1727_s17, %s2042_s17   ;;  %s1676_s16 = sphi %s1725_s16, %s2041_s16   ;;  %s1672_s15 = sphi %s1723_s15, %s2040_s15  }
   0x4   : > { %s1748_s21 = sadd.s32 1, %s1684_s18   ;;  %s113_s22 = sadd.s32 1, %s1680_s17 }
   0x5   : > { %s110_s23 = ssub.s32 %s1684_s18, %s1748_s21  ;;  %p123_p0 = scmp.ne.s32.totalorder %s1680_s17, %s1676_s16 }
   0x6   : > { %p111_p1 = scmp.eq.s32.totalorder %s110_s23, 0  ;;  %p124_p2 = scmp.eq.s32.totalorder %s1744_s19, 1 }
   0x7   : > { %p129_p3 = scmp.ne.s32.totalorder %s1676_s16, %s1672_s15  ;;  %p130_p4 = scmp.eq.s32.totalorder %s1230_s20, 1 }
   0x8   : > { %s1759_s24 = scalar_select %p111_p1, %s1680_s17, %s113_s22  }
   0x9   : > { %p1761_p5 = por %p124_p2, %p123_p0  ;;  %p1765_p6 = por %p130_p4, %p129_p3 }
   0xa   : > { %p1233_p7 = scmp.ge.s32.totalorder %s1684_s18, 1  ;;  %p165_p8 = scmp.lt.s32.totalorder %s1684_s18, 3 }
   0xc   : > { %p166_p9 = pnand %p1233_p7, %p165_p8 }
   0xd   : > { %p191_p10 = scmp.lt.s32.totalorder (!%p166_p9), %s1744_s19, 1  ;;  %v196_v0 = vld [vmem:[%s2034_s1] sm:$0xff] (!%p166_p9)  ;;  %vm213_vm0 = vcmask (!%p166_p9), 261120   ;;  %v1686_v1 = vmov (!%p166_p9), 0   ;;  %v206_v3 = vld [vmem:[%s2035_s2 + $0x10] sm:$0xff] (!%p166_p9)  ;;  %v205_v4 = vld [vmem:[%s2035_s2 + $0x8] sm:$0xff] (!%p166_p9) }
   0xe   : > { %169 = sbr.rel (%p166_p9) target bundleno = 773 (0x305), region = 36  ;;  %1318 = vmatprep.mubr.msk.f32.mxu0 (!%p166_p9), %vm213_vm0, %v196_v0  ;;  %1524 = vset.pattern.permute.xlu0 (!%p166_p9), %v1686_v1  ;;  %v204_v2 = vld [vmem:[%s2035_s2] sm:$0xff] (!%p166_p9)  ;;  %v207_v5 = vld [vmem:[%s2035_s2 + $0x18] sm:$0xff] (!%p166_p9)  ;;  %v197_v12 = vld [vmem:[%s2034_s1 + $0x8] sm:$0xff] (!%p166_p9)  ;;  %v1687_v19 = vmov (!%p166_p9), 4   ;;  %v1688_v29 = vmov (!%p166_p9), 1  }
   0xf   : > { %345 = vperm.xlu0 (!%p166_p9), %1524, %v204_v2   ;;  %1525 = vset.pattern.permute.xlu1 (!%p166_p9), %v1686_v1  ;;  %v198_v13 = vld [vmem:[%s2034_s1 + $0x10] sm:$0xff] (!%p166_p9)  ;;  %v199_v14 = vld [vmem:[%s2034_s1 + $0x18] sm:$0xff] (!%p166_p9)  ;;  %v200_v15 = vld [vmem:[%s2034_s1 + $0x20] sm:$0xff] (!%p166_p9)  ;;  %v1689_v33 = vmov (!%p166_p9), 3   ;;  %v1690_v35 = vmov (!%p166_p9), 5   ;;  %v1691_v37 = vmov (!%p166_p9), 0.0|0.0  }
  0x10   : > { %355 = vperm.xlu1 (!%p166_p9), %1525, %v206_v3   ;;  %v201_v16 = vld [vmem:[%s2034_s1 + $0x28] sm:$0xff] (!%p166_p9)  ;;  %v202_v17 = vld [vmem:[%s2034_s1 + $0x30] sm:$0xff] (!%p166_p9)  ;;  %v203_v18 = vld [vmem:[%s2034_s1 + $0x38] sm:$0xff] (!%p166_p9)  ;;  %1426 = vmatprep.subr.bf16.mxu1 (!%p166_p9), %v1691_v37  ;;  %v1692_v38 = vmov (!%p166_p9), 2   ;;  %v1693_v39 = vmov (!%p166_p9), 6   ;;  %v1694_v42 = vmov (!%p166_p9), 7  }
  0x11   : > { %vm1695_vm1 = vmmov (!%p166_p9), 0   ;;  %v1696_v43 = vmov (!%p166_p9), 0.0   ;;  %vm468_vm2 = vcmask (!%p166_p9), 57344   ;;  %vm1136_vm3 = vcmask (!%p166_p9), 64512   ;;  %s1254_s23 = sshll.u32 (!%p166_p9), %s1744_s19, 7 }
  0x12   : > { %1338 = vmatprep.mubr.msk.f32.mxu1 (!%p166_p9), %vm1695_vm1, %v1696_v43 }
  0x13   : > { %350 = vperm.xlu0 (!%p166_p9), %1524, %v205_v4  }
  0x14   : > { %360 = vperm.xlu1 (!%p166_p9), %1525, %v207_v5  }
  0x15   : > { %s192_s5 = scalar_select %p191_p10, %s1744_s19, 1 }
  0x16   : > { %s1697_s19 = smov [#allocation3]  }
  0x17   : > { %s1257_s10 = sshll.u32 %s192_s5, 5  ;;  %1528 = vset.pattern.permute.xlu0 %v1687_v19  ;;  %s1990_s5 = scalar_lea.hbm %s2037_s4, %s1254_s23 }
  0x18   : > { %s195_s20 = scalar_lea.vmem %s2033_s0, %s1257_s10  ;;  %s1626_s8 = sshll.u32 %s1697_s19, 4  ;;  %s1627_s8 = int_to_ptr.vmem [resolvable:$false] %s1626_s8 }
  0x19   : > { %v209_v6 = vld [vmem:[%s195_s20] sm:$0xff]  ;;  %v210_v7 = vld [vmem:[%s195_s20 + $0x8] sm:$0xff]  ;;  %v211_v8 = vld [vmem:[%s195_s20 + $0x10] sm:$0xff]  ;;  %s1628_s9 = scalar_lea.vmem %s1627_s8, 256 }
  0x1a   : > { %v1418_v9 = vpack.c.bf16 %v210_v7, %v209_v6  ;;  %v212_v10 = vld [vmem:[%s195_s20 + $0x18] sm:$0xff]  ;;  %s188_s20 = sand.u32 1, %s1676_s16  }
  0x1b   : > { %v1422_v11 = vpack.c.bf16 %v212_v10, %v211_v8  ;;  %s1234_s22 = sshll.u32 %s188_s20, 3  ;;  %s1158_s6 = scalar_lea.sflag [#allocation4], %s188_s20 }
  0x1c   : > { %1419 = vmatprep.subr.bf16.mxu0 %v1418_v9  ;;  %s190_s27 = scalar_lea.vmem [#allocation3], %s1234_s22 }
  0x1d   : > { %1421 = vmatpush3.bf16.msra.mxu0 %v1418_v9  ;;  %s1171_s28 = sshll.u32 %s190_s27, 4  ;;  %s1992_s28 = int_to_ptr.vmem [resolvable:$true] %s1171_s28 }
  0x1e   : > { %1423 = vmatprep.subr.bf16.mxu0 %v1422_v11  ;;  %s1622_s7 = scalar_lea.vmem %s1992_s28, 128  ;;  %p1629_p0 = scmp.lt.s32.totalorder %s1992_s28, %s1627_s8 }
  0x1f   : > { %p1623_p11 = scmp.ne.s32.totalorder %s1992_s28, %s1622_s7  ;;  %p1630_p1 = scmp.lt.s32.totalorder %s1628_s9, %s1622_s7 }
  0x21   : > { %1425 = vmatpush3.bf16.msra.mxu0 %v1422_v11  ;;  %p1624_p12 = pnand %p1623_p11, %p1761_p5  ;;  %p1631_p2 = por %p1630_p1, %p1629_p0 }
  0x22   : > { %1438 = vmatprep.subr.bf16.mxu0 %v1691_v37 }
  0x23   : > { %p1625_p13 = pneg %p1624_p12 }
  0x24   : > { %1319 = vmatmul.mubr.msk.f32.vlgmr.msra.gmra.mrb[0].mxu0 %vm213_vm0, %v197_v12 }
  0x25   : > { %1321 = vmatprep.mubr.msk.f32.mxu0 %vm213_vm0, %v198_v13  ;;  %p1632_p3 = pnand %p1631_p2, %p1625_p13 }
  0x28   : > { %1322 = vmatmul.mubr.msk.f32.gmra.mrb[2].mxu0 %vm213_vm0, %v199_v14 }
  0x29   : > { %1324 = vmatprep.mubr.msk.f32.mxu0 %vm213_vm0, %v200_v15 }
  0x2c   : > { %1325 = vmatmul.mubr.msk.f32.gmra.mrb[4].mxu0 %vm213_vm0, %v201_v16 }
  0x2d   : > { %1327 = vmatprep.mubr.msk.f32.mxu0 %vm213_vm0, %v202_v17 }
  0x30   : > { %1328 = vmatmul.mubr.msk.f32.gmra.mrb[6].mxu0 %vm213_vm0, %v203_v18 }
  0x31   : > { %1360 = vmatprep.mubr.msk.f32.mxu0 %vm1695_vm1, %v1696_v43 }
  0x8e   : > { %v346_v20 = vpop.permute.xlu0 %345 }
  0x8f   : > { %v356_v25 = vpop.permute.xlu1 %355 }
  0x92   : > { %v351_v21 = vpop.permute.xlu0 %350 }
  0x93   : > { %v361_v32 = vpop.permute.xlu1 %360 }
  0xf7   : > { %v1320_v22 = vpop.f32.mrb[0].mxu0 }
  0xf8   : > { %v1823_v23 = vadd.f32 %v1320_v22, %v351_v21  ;;  %v304_v24 = vpop.f32.mrb[1].mxu0 }
  0xf9   : > { %v1827_v28 = vadd.f32 %v346_v20, %v304_v24 }
  0xfa   : > { %760 = vperm.xlu0 %1528, %v1823_v23   ;;  %374 = vperm.xlu1 %1525, %v1823_v23  }
  0xfb   : > { %v1323_v26 = vpop.f32.mrb[2].mxu0 }
  0xfc   : > { %v314_v27 = vpop.f32.mrb[3].mxu0  ;;  %v366_v34 = vadd.f32 %v1323_v26, %v361_v32 }
  0xfd   : > { %v365_v36 = vadd.f32 %v356_v25, %v314_v27 }
  0xfe   : > { %1530 = vset.pattern.permute.xlu0 %v1686_v1  ;;  %1526 = vset.pattern.permute.xlu1 %v1688_v29 }
  0xff   : > { %475 = vperm.xlu1 %1526, %v1823_v23   ;;  %369 = vperm.xlu0 %1530, %v1827_v28   ;;  %v1832_v30 = vpop.f32.mrb[4].mxu0 }
 0x100   : > { %v1834_v31 = vpop.f32.mrb[5].mxu0 }
 0x103   : > { %1527 = vset.pattern.permute.xlu1 %v1689_v33  ;;  %1531 = vset.pattern.permute.xlu0 %v1688_v29  ;;  %v1849_v40 = vpop.f32.mrb[6].mxu0 }
 0x104   : > { %665 = vperm.xlu1 %1527, %v1823_v23   ;;  %471 = vperm.xlu0 %1531, %v1827_v28   ;;  %v1851_v41 = vpop.f32.mrb[7].mxu0 }
 0x108   : > { %1529 = vset.pattern.permute.xlu1 %v1690_v35  ;;  %483 = vperm.xlu0 %1531, %v366_v34  }
 0x109   : > { %855 = vperm.xlu1 %1529, %v1823_v23  }
 0x10c   : > { %1540 = vset.pattern.permute.xlu0 %v1686_v1 }
 0x10d   : > { %1532 = vset.pattern.permute.xlu1 %v1692_v38  ;;  %379 = vperm.xlu0 %1540, %v365_v36  }
 0x10e   : > { %566 = vperm.xlu1 %1532, %v1827_v28  }
 0x111   : > { %1544 = vset.pattern.permute.xlu0 %v1693_v39 }
 0x112   : > { %1533 = vset.pattern.permute.xlu1 %v1689_v33  ;;  %950 = vperm.xlu0 %1544, %v1823_v23  }
 0x113   : > { %661 = vperm.xlu1 %1533, %v1827_v28  }
 0x116   : > { %1545 = vset.pattern.permute.xlu0 %v1692_v38 }
 0x117   : > { %1534 = vset.pattern.permute.xlu1 %v1687_v19  ;;  %570 = vperm.xlu0 %1545, %v1823_v23  }
 0x118   : > { %756 = vperm.xlu1 %1534, %v1827_v28  }
 0x11b   : > { %574 = vperm.xlu0 %1545, %v365_v36  }
 0x11c   : > { %1535 = vset.pattern.permute.xlu1 %v1690_v35 }
 0x11d   : > { %851 = vperm.xlu1 %1535, %v1827_v28  }
 0x11f   : > { %1548 = vset.pattern.permute.xlu0 %v1689_v33 }
 0x120   : > { %669 = vperm.xlu0 %1548, %v365_v36  }
 0x121   : > { %1536 = vset.pattern.permute.xlu1 %v1686_v1 }
 0x122   : > { %384 = vperm.xlu1 %1536, %v366_v34  }
 0x124   : > { %1549 = vset.pattern.permute.xlu0 %v1687_v19 }
 0x125   : > { %764 = vperm.xlu0 %1549, %v365_v36  }
 0x126   : > { %1537 = vset.pattern.permute.xlu1 %v1692_v38 }
 0x127   : > { %578 = vperm.xlu1 %1537, %v366_v34  }
 0x129   : > { %1550 = vset.pattern.permute.xlu0 %v1690_v35 }
 0x12a   : > { %859 = vperm.xlu0 %1550, %v365_v36  }
 0x12b   : > { %1538 = vset.pattern.permute.xlu1 %v1689_v33 }
 0x12c   : > { %673 = vperm.xlu1 %1538, %v366_v34  }
 0x12e   : > { %1551 = vset.pattern.permute.xlu0 %v1693_v39 }
 0x12f   : > { %954 = vperm.xlu0 %1551, %v365_v36  }
 0x130   : > { %1539 = vset.pattern.permute.xlu1 %v1687_v19 }
 0x131   : > { %768 = vperm.xlu1 %1539, %v366_v34  }
 0x133   : > { %1552 = vset.pattern.permute.xlu0 %v1694_v42 }
 0x134   : > { %1049 = vperm.xlu0 %1552, %v365_v36  }
 0x135   : > { %1541 = vset.pattern.permute.xlu1 %v1688_v29 }
 0x136   : > { %479 = vperm.xlu1 %1541, %v365_v36  }
 0x13a   : > { %1542 = vset.pattern.permute.xlu1 %v1690_v35 }
 0x13b   : > { %863 = vperm.xlu1 %1542, %v366_v34  }
 0x13f   : > { %1543 = vset.pattern.permute.xlu1 %v1693_v39 }
 0x140   : > { %946 = vperm.xlu1 %1543, %v1827_v28  }
 0x144   : > { %1546 = vset.pattern.permute.xlu1 %v1694_v42 }
 0x145   : > { %1041 = vperm.xlu1 %1546, %v1827_v28  }
 0x149   : > { %1045 = vperm.xlu1 %1546, %v1823_v23  }
 0x14d   : > { %1547 = vset.pattern.permute.xlu1 %v1693_v39 }
 0x14e   : > { %958 = vperm.xlu1 %1547, %v366_v34  }
 0x152   : > { %1553 = vset.pattern.permute.xlu1 %v1694_v42 }
 0x153   : > { %1053 = vperm.xlu1 %1553, %v366_v34  }
 0x179   : > { %v761_v44 = vpop.permute.xlu0 %760  ;;  %v375_v45 = vpop.permute.xlu1 %374 }
 0x17a   : > { %v388_v46 = vadd.f32 %v1832_v30, %v375_v45  ;;  %v772_v4 = vadd.f32 %v1832_v30, %v761_v44 }
 0x17c   : > { %1554 = vtanh.f32 %v388_v46 }
 0x17e   : > { %v476_v47 = vpop.permute.xlu1 %475  ;;  %v370_v48 = vpop.permute.xlu0 %369 }
 0x17f   : > { %v387_v49 = vadd.f32 %v370_v48, %v1834_v31  ;;  %v487_v50 = vadd.f32 %v1832_v30, %v476_v47 }
 0x181   : > { %1556 = vtanh.f32 %v387_v49  ;;  %v1910_v49 = vld [vmem:[%s2036_s3] sm:$0x1] }
 0x182   : > { %1558 = vtanh.f32 %v487_v50 }
 0x183   : > { %v666_v51 = vpop.permute.xlu1 %665  ;;  %v472_v52 = vpop.permute.xlu0 %471 }
 0x184   : > { %v486_v53 = vadd.f32 %v472_v52, %v1834_v31  ;;  %v677_v62 = vadd.f32 %v1832_v30, %v666_v51 }
 0x186   : > { %1560 = vtanh.f32 %v486_v53  ;;  %v1555_v56 = vpop.eup %1554 }
 0x187   : > { %v1867_v54 = vpop.permute.xlu0 %483  ;;  %1562 = vtanh.f32 %v677_v62 }
 0x188   : > { %v856_v55 = vpop.permute.xlu1 %855  ;;  %v489_v52 = vadd.f32 %v1849_v40, %v1867_v54 }
 0x189   : > { %v867_v10 = vadd.f32 %v1832_v30, %v856_v55 }
 0x18b   : > { %v1557_v57 = vpop.eup %1556 }
 0x18c   : > { %v380_v58 = vpop.permute.xlu0 %379  ;;  %v1427_v60 = vpack.c.bf16 %v1555_v56, %v1557_v57  ;;  %v1869_v61 = vpop.eup %1558 }
 0x18d   : > { %v567_v59 = vpop.permute.xlu1 %566  ;;  %v389_v16 = vadd.f32 %v380_v58, %v1851_v41 }
 0x18e   : > { %1428 = vmatpush3.bf16.msra.mxu1 %v1427_v60  ;;  %v581_v5 = vadd.f32 %v567_v59, %v1834_v31 }
 0x18f   : > { %1429 = vmatprep.subr.bf16.mxu1 %v1691_v37 }
 0x190   : > { %v1873_v63 = vpop.eup %1560 }
 0x191   : > { %v1875_v0 = vpop.permute.xlu0 %950  ;;  %v1433_v2 = vpack.c.bf16 %v1869_v61, %v1873_v63  ;;  %v1886_v13 = vpop.eup %1562 }
 0x192   : > { %v662_v1 = vpop.permute.xlu1 %661 }
 0x193   : > { %v676_v3 = vadd.f32 %v662_v1, %v1834_v31 }
 0x195   : > { %1564 = vtanh.f32 %v676_v3 }
 0x196   : > { %v571_v6 = vpop.permute.xlu0 %570  ;;  %1566 = vtanh.f32 %v772_v4 }
 0x197   : > { %v582_v7 = vadd.f32 %v1832_v30, %v571_v6  ;;  %v757_v8 = vpop.permute.xlu1 %756  ;;  %1568 = vtanh.f32 %v581_v5 }
 0x198   : > { %v771_v9 = vadd.f32 %v757_v8, %v1834_v31 }
 0x199   : > { %1570 = vtanh.f32 %v582_v7 }
 0x19a   : > { %1572 = vtanh.f32 %v771_v9  ;;  %v575_v15 = vpop.permute.xlu0 %574 }
 0x19b   : > { %1574 = vtanh.f32 %v867_v10  ;;  %v583_v25 = vadd.f32 %v575_v15, %v1851_v41 }
 0x19c   : > { %v852_v11 = vpop.permute.xlu1 %851 }
 0x19d   : > { %v866_v12 = vadd.f32 %v852_v11, %v1834_v31 }
 0x19f   : > { %v1888_v14 = vpop.eup %1564  ;;  %1576 = vtanh.f32 %v866_v12  ;;  %v670_v26 = vpop.permute.xlu0 %669 }
 0x1a0   : > { %v1445_v17 = vpack.c.bf16 %v1886_v13, %v1888_v14  ;;  %v1567_v18 = vpop.eup %1566  ;;  %1578 = vtanh.f32 %v389_v16  ;;  %v678_v34 = vadd.f32 %v670_v26, %v1851_v41 }
 0x1a1   : > { %v385_v19 = vpop.permute.xlu1 %384  ;;  %v1569_v20 = vpop.eup %1568 }
 0x1a2   : > { %v390_v21 = vadd.f32 %v1849_v40, %v385_v19 }
 0x1a3   : > { %v1571_v22 = vpop.eup %1570 }
 0x1a4   : > { %v1573_v23 = vpop.eup %1572  ;;  %1580 = vtanh.f32 %v390_v21  ;;  %v1439_v24 = vpack.c.bf16 %v1571_v22, %v1569_v20  ;;  %v765_v36 = vpop.permute.xlu0 %764 }
 0x1a5   : > { %v1451_v27 = vpack.c.bf16 %v1567_v18, %v1573_v23  ;;  %v1897_v32 = vpop.eup %1574  ;;  %1582 = vtanh.f32 %v583_v25  ;;  %v773_v45 = vadd.f32 %v765_v36, %v1851_v41 }
 0x1a6   : > { %v579_v28 = vpop.permute.xlu1 %578  ;;  %1440 = vmatpush3.bf16.msra.mxu0 %v1439_v24 }
 0x1a7   : > { %v584_v29 = vadd.f32 %v1849_v40, %v579_v28  ;;  %1441 = vmatprep.subr.bf16.mxu0 %v1691_v37 }
 0x1a9   : > { %v1899_v33 = vpop.eup %1576  ;;  %1584 = vtanh.f32 %v584_v29  ;;  %v860_v55 = vpop.permute.xlu0 %859 }
 0x1aa   : > { %v1457_v35 = vpack.c.bf16 %v1897_v32, %v1899_v33  ;;  %v1579_v42 = vpop.eup %1578  ;;  %1586 = vtanh.f32 %v678_v34  ;;  %v868_v59 = vadd.f32 %v860_v55, %v1851_v41 }
 0x1ab   : > { %v674_v38 = vpop.permute.xlu1 %673 }
 0x1ac   : > { %v679_v39 = vadd.f32 %v1849_v40, %v674_v38 }
 0x1ae   : > { %v1581_v44 = vpop.eup %1580  ;;  %1588 = vtanh.f32 %v679_v39  ;;  %v955_v12 = vpop.permute.xlu0 %954 }
 0x1af   : > { %v1430_v46 = vpack.c.bf16 %v1581_v44, %v1579_v42  ;;  %v1583_v50 = vpop.eup %1582  ;;  %1590 = vtanh.f32 %v773_v45  ;;  %v963_v19 = vadd.f32 %v955_v12, %v1851_v41 }
 0x1b0   : > { %v769_v47 = vpop.permute.xlu1 %768 }
 0x1b1   : > { %v774_v48 = vadd.f32 %v1849_v40, %v769_v47  ;;  %1431 = vmatpush3.bf16.msra.mxu1 %v1430_v46 }
 0x1b2   : > { %1432 = vmatprep.subr.bf16.mxu1 %v1691_v37 }
 0x1b3   : > { %v1585_v51 = vpop.eup %1584  ;;  %1592 = vtanh.f32 %v774_v48  ;;  %v1050_v21 = vpop.permute.xlu0 %1049 }
 0x1b4   : > { %1339 = vmatmul.mubr.msk.f32.vlgmr.msra.gmra.mrb[0].mxu1 %vm213_vm0, %v1910_v49  ;;  %v1442_v53 = vpack.c.bf16 %v1585_v51, %v1583_v50  ;;  %v1587_v58 = vpop.eup %1586  ;;  %1594 = vtanh.f32 %v489_v52  ;;  %v1058_v13 = vadd.f32 %v1050_v21, %v1851_v41 }
 0x1b5   : > { %v480_v56 = vpop.permute.xlu1 %479  ;;  %1434 = vmatpush3.bf16.msra.mxu1 %v1433_v2  ;;  %1349 = vmatprep.mubr.msk.f32.mxu1 %vm1695_vm1, %v1696_v43  ;;  %v962_v2 = vadd.f32 %v1832_v30, %v1875_v0 }
 0x1b6   : > { %v488_v57 = vadd.f32 %v480_v56, %v1851_v41  ;;  %1443 = vmatpush3.bf16.msra.mxu0 %v1442_v53  ;;  %1435 = vmatprep.subr.bf16.mxu1 %v1691_v37 }
 0x1b7   : > { %1450 = vmatprep.subr.bf16.mxu0 %v1691_v37 }
 0x1b8   : > { %v1589_v54 = vpop.eup %1588  ;;  %1596 = vtanh.f32 %v488_v57 }
 0x1b9   : > { %1361 = vmatmul.mubr.msk.f32.vlgmr.msra.gmra.mrb[8].mxu0 %vm213_vm0, %v1910_v49  ;;  %v1448_v60 = vpack.c.bf16 %v1589_v54, %v1587_v58  ;;  %v1591_v63 = vpop.eup %1590  ;;  %1598 = vtanh.f32 %v868_v59 }
 0x1ba   : > { %v864_v61 = vpop.permute.xlu1 %863  ;;  %1452 = vmatpush3.bf16.msra.mxu0 %v1451_v27  ;;  %1382 = vmatprep.mubr.msk.f32.mxu0 %vm1695_vm1, %v1696_v43 }
 0x1bb   : > { %v869_v62 = vadd.f32 %v1849_v40, %v864_v61  ;;  %1453 = vmatprep.subr.bf16.mxu0 %v1691_v37 }
 0x1bd   : > { %v1593_v1 = vpop.eup %1592  ;;  %1600 = vtanh.f32 %v869_v62 }
 0x1be   : > { %v1454_v3 = vpack.c.bf16 %v1593_v1, %v1591_v63  ;;  %v1595_v6 = vpop.eup %1594  ;;  %1602 = vtanh.f32 %v962_v2 }
 0x1bf   : > { %v947_v4 = vpop.permute.xlu1 %946 }
 0x1c0   : > { %v961_v5 = vadd.f32 %v947_v4, %v1834_v31  ;;  %1455 = vmatpush3.bf16.msra.mxu0 %v1454_v3 }
 0x1c1   : > { %1462 = vmatprep.subr.bf16.mxu0 %v1691_v37 }
 0x1c2   : > { %v1597_v7 = vpop.eup %1596  ;;  %1604 = vtanh.f32 %v961_v5 }
 0x1c3   : > { %v1436_v8 = vpack.c.bf16 %v1595_v6, %v1597_v7  ;;  %1383 = vmatmul.mubr.msk.f32.vlgmr.msra.gmra.mrb[10].mxu0 %vm213_vm0, %v1910_v49  ;;  %v1599_v0 = vpop.eup %1598 }
 0x1c4   : > { %v1042_v9 = vpop.permute.xlu1 %1041  ;;  %1404 = vmatprep.mubr.msk.f32.mxu0 %vm1695_vm1, %v1696_v43 }
 0x1c5   : > { %1437 = vmatpush3.bf16.msra.mxu1 %v1436_v8  ;;  %v1056_v10 = vadd.f32 %v1042_v9, %v1834_v31 }
 0x1c6   : > { %1444 = vmatprep.subr.bf16.mxu1 %v1691_v37 }
 0x1c7   : > { %v1601_v11 = vpop.eup %1600  ;;  %1606 = vtanh.f32 %v1056_v10 }
 0x1c8   : > { %v1046_v15 = vpop.permute.xlu1 %1045  ;;  %1350 = vmatmul.mubr.msk.f32.vlgmr.msra.gmra.mrb[2].mxu1 %vm213_vm0, %v1910_v49  ;;  %v1460_v16 = vpack.c.bf16 %v1601_v11, %v1599_v0  ;;  %v1603_v31 = vpop.eup %1602 }
 0x1c9   : > { %v1057_v18 = vadd.f32 %v1832_v30, %v1046_v15  ;;  %1446 = vmatpush3.bf16.msra.mxu1 %v1445_v17  ;;  %1371 = vmatprep.mubr.msk.f32.mxu1 %vm1695_vm1, %v1696_v43 }
 0x1ca   : > { %1447 = vmatprep.subr.bf16.mxu1 %v1691_v37 }
 0x1cb   : > { %1608 = vtanh.f32 %v1057_v18 }
 0x1cc   : > { %v1605_v20 = vpop.eup %1604  ;;  %1610 = vtanh.f32 %v963_v19 }
 0x1cd   : > { %v959_v22 = vpop.permute.xlu1 %958  ;;  %1449 = vmatpush3.bf16.msra.mxu1 %v1448_v60  ;;  %v1463_v23 = vpack.c.bf16 %v1603_v31, %v1605_v20 }
 0x1ce   : > { %v964_v30 = vadd.f32 %v1849_v40, %v959_v22  ;;  %1456 = vmatprep.subr.bf16.mxu1 %v1691_v37 }
 0x1cf   : > { %1464 = vmatpush3.bf16.msra.mxu0 %v1463_v23 }
 0x1d0   : > { %1612 = vtanh.f32 %v964_v30  ;;  %1372 = vmatmul.mubr.msk.f32.vlgmr.msra.gmra.mrb[4].mxu1 %vm213_vm0, %v1910_v49  ;;  %1465 = vmatprep.subr.bf16.mxu0 %v1691_v37 }
 0x1d1   : > { %1458 = vmatpush3.bf16.msra.mxu1 %v1457_v35  ;;  %1393 = vmatprep.mubr.msk.f32.mxu1 %vm1695_vm1, %v1696_v43  ;;  %v1607_v24 = vpop.eup %1606  ;;  %1614 = vtanh.f32 %v1058_v13 }
 0x1d2   : > { %v1054_v14 = vpop.permute.xlu1 %1053  ;;  %1459 = vmatprep.subr.bf16.mxu1 %v1691_v37 }
 0x1d3   : > { %v1059_v17 = vadd.f32 %v1849_v40, %v1054_v14 }
 0x1d5   : > { %v1609_v41 = vpop.eup %1608  ;;  %1616 = vtanh.f32 %v1059_v17  ;;  %1461 = vmatpush3.bf16.msra.mxu1 %v1460_v16 }
 0x1d6   : > { %1468 = vmatprep.subr.bf16.mxu1 %v1691_v37  ;;  %v1469_v25 = vpack.c.bf16 %v1609_v41, %v1607_v24  ;;  %v1611_v26 = vpop.eup %1610 }
 0x1d8   : > { %1394 = vmatmul.mubr.msk.f32.vlgmr.msra.gmra.mrb[6].mxu1 %vm213_vm0, %v1910_v49 }
 0x1d9   : > { %1470 = vmatpush3.bf16.msra.mxu1 %v1469_v25  ;;  %1415 = vmatprep.mubr.msk.f32.mxu1 %vm1695_vm1, %v1696_v43 }
 0x1da   : > { %v1613_v27 = vpop.eup %1612  ;;  %1471 = vmatprep.subr.bf16.mxu1 %v1691_v37 }
 0x1db   : > { %v1466_v40 = vpack.c.bf16 %v1613_v27, %v1611_v26  ;;  %v1615_v28 = vpop.eup %1614 }
 0x1dd   : > { %1467 = vmatpush3.bf16.msra.mxu0 %v1466_v40 }
 0x1df   : > { %v1617_v29 = vpop.eup %1616 }
 0x1e0   : > { %v1472_v32 = vpack.c.bf16 %v1617_v29, %v1615_v28  ;;  %1405 = vmatmul.mubr.msk.f32.vlgmr.msra.gmra.mrb[12].mxu0 %vm213_vm0, %v1910_v49 }
 0x1e2   : > { %1473 = vmatpush3.bf16.msra.mxu1 %v1472_v32 }
 0x1e5   : > { %1416 = vmatmul.mubr.msk.f32.vlgmr.msra.gmra.mrb[8].mxu1 %vm213_vm0, %v1910_v49 }
 0x287   : > { %v464_v33 = vpop.f32.mrb[0].mxu1 }
 0x288   : > { %469 = vst.msk [vmem:[#allocation2] sm:$0x1] %vm468_vm2, %v464_v33  ;;  %v1340_v43 = vpop.f32.mrb[1].mxu1 }
 0x28c   : > { %v655_v34 = vpop.f32.mrb[8].mxu0 }
 0x28d   : > { %659 = vst.msk [vmem:[#allocation2 + $0x2] sm:$0x1] %vm468_vm2, %v655_v34  ;;  %v1362_v37 = vpop.f32.mrb[9].mxu0 }
 0x296   : > { %v845_v35 = vpop.f32.mrb[10].mxu0 }
 0x297   : > { %849 = vst.msk [vmem:[#allocation2 + $0x4] sm:$0x1] %vm468_vm2, %v845_v35  ;;  %v1384_v36 = vpop.f32.mrb[11].mxu0 }
 0x29b   : > { %v560_v38 = vpop.f32.mrb[2].mxu1 }
 0x29c   : > { %564 = vst.msk [vmem:[#allocation2 + $0x1] sm:$0x1] %vm468_vm2, %v560_v38  ;;  %v1351_v39 = vpop.f32.mrb[3].mxu1 }
 0x2a3   : > { %v750_v42 = vpop.f32.mrb[4].mxu1 }
 0x2a4   : > { %754 = vst.msk [vmem:[#allocation2 + $0x3] sm:$0x1] %vm468_vm2, %v750_v42  ;;  %v1373_v44 = vpop.f32.mrb[5].mxu1 }
 0x2ab   : > { %v940_v45 = vpop.f32.mrb[6].mxu1 }
 0x2ac   : > { %944 = vst.msk [vmem:[#allocation2 + $0x5] sm:$0x1] %vm468_vm2, %v940_v45  ;;  %v1395_v46 = vpop.f32.mrb[7].mxu1 }
 0x2b3   : > { %v1035_v47 = vpop.f32.mrb[12].mxu0 }
 0x2b4   : > { %1039 = vst.msk [vmem:[#allocation2 + $0x6] sm:$0x1] %vm468_vm2, %v1035_v47  ;;  %v1406_v48 = vpop.f32.mrb[13].mxu0 }
 0x2b8   : > { %v1130_v49 = vpop.f32.mrb[8].mxu1 }
 0x2b9   : > { %1134 = vst.msk [vmem:[#allocation2 + $0x7] sm:$0x1] %vm468_vm2, %v1130_v49  ;;  %v1417_v50 = vpop.f32.mrb[9].mxu1 }
 0x2c0   : > { %v1135_v51 = vld [vmem:[#allocation2] sm:$0xff] }
 0x2c1   : > { %v1137_v52 = vsel %vm1136_vm3, %v1135_v51, -inf }
 0x2c2   : > { %v1138_v53 = vrot.slane %v1137_v52, 4 }
 0x2c4   : > { %v1139_v55 = vmax.f32 %v1137_v52, %v1138_v53 }
 0x2c6   : > { %v1140_v56 = vrot.slane %v1139_v55, 2 }
 0x2c8   : > { %v1141_v57 = vmax.f32 %v1139_v55, %v1140_v56 }
 0x2ca   : > { %v1142_v58 = vrot.slane %v1141_v57, 1 }
 0x2cc   : > { %v1143_v54 = vmax.f32 %v1141_v57, %v1142_v58 }
 0x2ce   : > { %v1144_v59 = vsub.f32 %v1135_v51, %v1143_v54 }
 0x2d0   : > { %v1145_v60 = vmul.f32 1.442695, %v1144_v59 }
 0x2d2   : > { %1618 = vpow2.f32 %v1145_v60 }
 0x2dc   : > { %v1619_v61 = vpop.eup %1618 }
 0x2dd   : > { %v1147_v62 = vsel %vm1136_vm3, %v1619_v61, 0.0 }
 0x2de   : > { %v1148_v63 = vrot.slane %v1147_v62, 4 }
 0x2e0   : > { %v1149_v1 = vadd.f32 %v1148_v63, %v1147_v62 }
 0x2e2   : > { %v1150_v2 = vrot.slane %v1149_v1, 2 }
 0x2e4   : > { %v1151_v3 = vadd.f32 %v1150_v2, %v1149_v1 }
 0x2e6   : > { %v1152_v4 = vrot.slane %v1151_v3, 1 }
 0x2e8   : > { %v1153_v5 = vadd.f32 %v1152_v4, %v1151_v3 }
 0x2ea   : > { %1620 = vrcp.f32 %v1153_v5 }
 0x2f4   : > { %v1621_v6 = vpop.eup %1620 }
 0x2f5   : > { %v1155_v7 = vmul.f32 %v1621_v6, %v1619_v61 }
 0x2f7   : > { %1156 = vst.msk [vmem:[%s190_s27] sm:$0xff] %vm1136_vm3, %v1155_v7 }
 0x2f8   : > { %1635 = shalt.err (!%p1632_p3)
}
 0x2f9   : > { %s1636_s10 = scalar_lea.hbm %s1990_s5, 128  ;;  %s1640_s13 = scalar_lea.hbm %s2037_s4, 256 }
 0x2fa   : > { %p1637_p4 = scmp.ne.s32.totalorder %s1990_s5, %s1636_s10  ;;  %p1641_p9 = scmp.lt.u32.totalorder %s1990_s5, %s2037_s4 }
 0x2fb   : > { %p1642_p10 = scmp.lt.u32.totalorder %s1640_s13, %s1636_s10  ;;  %p1644_p12 = scmp.lt.u32.totalorder %s1636_s10, %s1990_s5 }
 0x2fc   : > { %p1638_p7 = pnand %p1637_p4, %p1761_p5 }
 0x2fd   : > { %p1643_p11 = por %p1642_p10, %p1641_p9 }
 0x2fe   : > { %p1639_p8 = pneg %p1638_p7 }
 0x2ff   : > { %p1645_p13 = por %p1644_p12, %p1643_p11 }
 0x301   : > { %p1646_p0 = pnand %p1645_p13, %p1639_p8 }
 0x303   : > { %1649 = shalt.err (!%p1646_p0)
}
 0x304   : > { %1474 = dma.vmem_to_hbm [thread:$0]  (%p1761_p5), %s1992_s28, 128, %s1990_s5, %s1158_s6  }
 0x305 PF: > { %p1480_p1 = scmp.ge.s32.totalorder %s1684_s18, 2  ;;  %s1183_s22 = sand.u32 1, %s1672_s15  }
 0x306   : > { %s1184_s23 = scalar_lea.sflag [#allocation4], %s1183_s22 }
 0x307   : > { %p1477_p2 = pnand %p1480_p1, %p1765_p6 }
 0x309   : > { %1667 = dma.done.wait (!%p1477_p2), %s1184_s23, 128  }
 0x30a   : > { %1669 = vsyncadd (!%p1477_p2), %s1184_s23, 4294967168  ;;  %p14_p3 = scmp.ge.s32.totalorder %s1748_s21, 4   ;;  %s2040_s15 = smov %s1676_s16 }
 0x30b   : > { %s2041_s16 = smov %s1680_s17  ;;  %s2042_s17 = smov %s1759_s24 }
 0x30c   : > { %s2043_s18 = smov %s1748_s21  ;;  %16 = sbr.rel (!%p14_p3) target bundleno = 3 (0x3), region = 71 }
 0x313   :  { %1189 = vsyncpa [#allocation4], 1 }
 0x314   :  { %1191 = vsyncpa [#allocation4 + $0x1], 1 }

</bundles_post_ra>
